<compile_context>
chip_gen: v6e
topology: v6e:2x2x1
jax: 0.10.0
libtpu: 0.0.40
codegen_flags: <defaults>
</compile_context>

<pallas_src>
import functools

import jax
import jax.numpy as jnp
import numpy as np
from jax.experimental import pallas as pl
from jax.experimental.pallas import tpu as pltpu

KEY_OUTPUT = "metric_depth"
_PI = float(np.pi)
_HALF_PI = float(np.pi / 2.0)
_NCORES = 2   # megacore split (v7x); 2 cheap sequential outer passes elsewhere


def _round_up(x, m):
    return ((x + m - 1) // m) * m


def _atan_poly(z):
    # Minimax polynomial approximation of atan(z) on |z| <= 1 (err ~3e-6 rad).
    w = z * z
    return z * (0.99997726
                + w * (-0.33262347
                       + w * (0.19354346
                              + w * (-0.11643287
                                     + w * (0.05265332
                                            + w * (-0.01172120))))))


def _atan2(y, x):
    # atan2 from VPU/EUP-friendly elementwise ops; matches torch.atan2 ~1e-4 rad.
    abs_y = jnp.abs(y)
    abs_x = jnp.abs(x)
    swap = abs_y > abs_x
    num = jnp.where(swap, x, y)
    den = jnp.where(swap, y, x)
    den = jnp.where(den == 0.0, 1e-30, den)
    z = num * pl.reciprocal(den, approx=True)   # EUP slot -> frees VALU cycles
    r = _atan_poly(z)
    sgn_y = jnp.where(y >= 0.0, 1.0, -1.0)
    # Single collapsed quadrant fix:
    #   swap            -> sgn(y)*pi/2 - r
    #   !swap and x < 0 -> r + sgn(y)*pi
    offset = jnp.where(swap, sgn_y * _HALF_PI,
                       jnp.where(x < 0.0, sgn_y * _PI, 0.0))
    sign = jnp.where(swap, -1.0, 1.0)
    return offset + sign * r


def _grad_l1_kernel(inp_ref, tgt_ref, msk_ref, acc_ref):
    # inp/tgt/msk: (TB, HP, WP) f32 VMEM tiles (data offset by +1 row/col).
    # acc_ref: (1, 2, HP, WP) f32 output block, resident across the inner axis.
    step = pl.program_id(1)

    @pl.when(step == 0)
    def _init():
        acc_ref[...] = jnp.zeros_like(acc_ref)

    x = inp_ref[...]
    t = tgt_ref[...]
    m = msk_ref[...]

    # Shifted neighbours via XLU rotates (aligned full-tile ops, no relayouts).
    x_l = pltpu.roll(x, 1, 2)   # x[..., i, j-1] (wraps at j=0; killed by mask)
    x_u = pltpu.roll(x, 1, 1)   # x[..., i-1, j] (wraps at i=0; killed by mask)
    t_l = pltpu.roll(t, 1, 2)
    t_u = pltpu.roll(t, 1, 1)
    m_l = pltpu.roll(m, 1, 2)
    m_u = pltpu.roll(m, 1, 1)

    dxp = x - x_l
    dyp = x - x_u
    dxg = t - t_l
    dyg = t - t_u

    mag_p = jnp.sqrt(dxp * dxp + dyp * dyp)
    mag_g = jnp.sqrt(dxg * dxg + dyg * dyg)
    ang_p = _atan2(dyp, dxp + 1e-10)
    ang_g = _atan2(dyg, dxg + 1e-10)

    # grad_mask.  Row 0 / column 0 of the padded slab are zero, so the invalid
    # first row/column of the stencil (and the roll wrap-around values, which
    # are finite) are removed exactly by this product -- no boundary iota.
    mg = m * m_l * m_u
    per_px = (jnp.abs(mag_p - mag_g) + jnp.abs(ang_p - ang_g)) * mg

    # Vectorized accumulation: reduce only over the cheap leading (map) axis;
    # cross-lane reductions are deferred to a single JAX sum on the output.
    acc_ref[0, 0, :, :] += jnp.sum(per_px, axis=0)
    acc_ref[0, 1, :, :] += jnp.sum(mg, axis=0)


def _pick_tiling(n_maps, hp, wp):
    """Generation-aware maps-per-step (TB) and VMEM limit."""
    map_bytes = hp * wp * 4
    try:
        cap = int(pltpu.get_tpu_info().vmem_capacity_bytes)
    except Exception:       # older jax / no info: assume smallest (v7x, 64 MiB)
        cap = 64 << 20
    acc_bytes = 2 * 2 * map_bytes                    # resident 2-plane accumulator
    budget = max(int(cap * 0.45) - acc_bytes, 3 * 2 * map_bytes)
    tb = max(1, budget // (3 * 2 * map_bytes))       # 3 inputs, double-buffered
    tb = int(min(tb, max(1, -(-n_maps // _NCORES)), 128))
    need = 3 * 2 * tb * map_bytes + acc_bytes + (2 << 20)
    vmem_limit = int(min(cap, max(need, 32 << 20)))
    # TODO(synk): extremely large maps (single map > VMEM budget) would need
    # additional H-tiling with a 1-row halo; not implemented.
    return tb, vmem_limit


def _resize_bilinear_align_corners(x, out_hw):
    """Pure-JAX bilinear, align_corners=True (matches F.interpolate)."""
    B, C, H, W = x.shape
    out_h, out_w = out_hw
    if (H, W) == (out_h, out_w):
        return x

    def src_coords(n_in, n_out):
        if n_out <= 1:
            return jnp.zeros((n_out,), jnp.float32)
        return jnp.arange(n_out, dtype=jnp.float32) * ((n_in - 1) / (n_out - 1))

    yy = src_coords(H, out_h)
    xx = src_coords(W, out_w)
    y0 = jnp.clip(jnp.floor(yy).astype(jnp.int32), 0, max(H - 2, 0))
    y1 = jnp.minimum(y0 + 1, H - 1)
    wy = yy - y0.astype(jnp.float32)
    x0 = jnp.clip(jnp.floor(xx).astype(jnp.int32), 0, max(W - 2, 0))
    x1 = jnp.minimum(x0 + 1, W - 1)
    wx = xx - x0.astype(jnp.float32)

    top = jnp.take(x, y0, axis=2)
    bot = jnp.take(x, y1, axis=2)
    v = top + (bot - top) * wy[None, None, :, None]
    left = jnp.take(v, x0, axis=3)
    right = jnp.take(v, x1, axis=3)
    return left + (right - left) * wx[None, None, None, :]


@functools.partial(jax.jit, static_argnames=("interpolate", "return_interpolated"))
def grad_l1_loss(input_dict, target, mask=None, interpolate=True,
                 return_interpolated=False):
    """JAX/Pallas equivalent of GradL1Loss.forward."""
    inp = input_dict[KEY_OUTPUT]
    if inp.shape[-1] != target.shape[-1] and interpolate:
        inp = _resize_bilinear_align_corners(inp, target.shape[-2:])

    B, C, H, W = target.shape
    n_maps = B * C
    if mask is None:
        mask = jnp.ones((B, C, H, W), jnp.bool_)

    inp_f = inp.reshape(n_maps, H, W).astype(jnp.float32)
    tgt_f = target.reshape(n_maps, H, W).astype(jnp.float32)
    msk_f = mask.reshape(n_maps, H, W).astype(jnp.float32)

    # Lane/sublane-dense padding with a +1 row/col offset: the zero border at
    # index 0 encodes grad_mask's boundary, and zero-padded masks keep every
    # padded pixel inert.
    hp = _round_up(H + 1, 8)
    wp = _round_up(W + 1, 128)
    tb, vmem_limit = _pick_tiling(n_maps, hp, wp)
    steps = -(-n_maps // (_NCORES * tb))
    n_pad = _NCORES * tb * steps

    cfg = ((0, n_pad - n_maps), (1, hp - H - 1), (1, wp - W - 1))
    inp_f = jnp.pad(inp_f, cfg)
    tgt_f = jnp.pad(tgt_f, cfg)
    msk_f = jnp.pad(msk_f, cfg)

    in_spec = pl.BlockSpec((tb, hp, wp), lambda c, i: (c * steps + i, 0, 0))
    parts = pl.pallas_call(
        _grad_l1_kernel,
        out_shape=jax.ShapeDtypeStruct((_NCORES, 2, hp, wp), jnp.float32),
        grid_spec=pltpu.PrefetchScalarGridSpec(
            num_scalar_prefetch=0,
            grid=(_NCORES, steps),
            in_specs=[in_spec, in_spec, in_spec],
            out_specs=pl.BlockSpec((1, 2, hp, wp), lambda c, i: (c, 0, 0, 0)),
        ),
        compiler_params=pltpu.CompilerParams(
            dimension_semantics=("parallel", "arbitrary"),
            vmem_limit_bytes=vmem_limit),
    )(inp_f, tgt_f, msk_f)

    sums = jnp.sum(parts, axis=(0, 2, 3))   # [sum(|dmag|+|dangle|), count]
    # F.l1_loss(pred[mask], gt[mask]) == masked-sum / count, for mag and angle;
    # both share the same count, so the two losses collapse into one divide.
    # (count == 0 -> NaN, same as PyTorch's empty-index l1_loss.)
    loss = sums[0] / sums[1]

    if return_interpolated:
        return loss, inp
    return loss


def _reference_loss(pred, target, mask):
    # Pure-JAX (XLA) reference mirroring the PyTorch module, for validation.
    dxp = pred[..., 1:, 1:] - pred[..., 1:, :-1]
    dyp = pred[..., 1:, 1:] - pred[..., :-1, 1:]
    dxg = target[..., 1:, 1:] - target[..., 1:, :-1]
    dyg = target[..., 1:, 1:] - target[..., :-1, 1:]
    mag_p = jnp.sqrt(dxp * dxp + dyp * dyp)
    mag_g = jnp.sqrt(dxg * dxg + dyg * dyg)
    ang_p = jnp.arctan2(dyp, dxp + 1e-10)
    ang_g = jnp.arctan2(dyg, dxg + 1e-10)
    mg = (mask[..., 1:, 1:] & mask[..., 1:, :-1]
          & mask[..., :-1, 1:]).astype(jnp.float32)
    cnt = jnp.sum(mg)
    return (jnp.sum(jnp.abs(mag_p - mag_g) * mg)
            + jnp.sum(jnp.abs(ang_p - ang_g) * mg)) / cnt


if __name__ == "__main__":
    key = jax.random.PRNGKey(0)
    k1, k2, k3, k4 = jax.random.split(key, 4)

    B, C, H, W = 2, 1, 20, 30   # depth maps: single channel; exercises padding
    pred = jax.random.uniform(k1, (B, C, H, W), jnp.float32,
                              minval=0.1, maxval=10.0)
    target = jax.random.uniform(k2, (B, C, H, W), jnp.float32,
                                minval=0.1, maxval=10.0)
    mask = jax.random.uniform(k3, (B, C, H, W), jnp.float32) > 0.2   # boolean

    # Case 1: matching spatial shapes.
    loss = jax.block_until_ready(grad_l1_loss({KEY_OUTPUT: pred}, target, mask))
    ref = jax.block_until_ready(_reference_loss(pred, target, mask))
    np.testing.assert_allclose(np.asarray(loss), np.asarray(ref),
                               rtol=1e-2, atol=1e-2)

    # Case 2: mismatched width -> align_corners=True bilinear resize path.
    pred_small = jax.random.uniform(k4, (B, C, 12, 17), jnp.float32,
                                    minval=0.1, maxval=10.0)
    loss2, pred_up = grad_l1_loss({KEY_OUTPUT: pred_small}, target, mask,
                                  return_interpolated=True)
    loss2 = jax.block_until_ready(loss2)
    ref2 = jax.block_until_ready(_reference_loss(pred_up, target, mask))
    np.testing.assert_allclose(np.asarray(loss2), np.asarray(ref2),
                               rtol=1e-2, atol=1e-2)

    print("KERNEL_OK")
</pallas_src>

<mosaic_0001>
module attributes {stable_mosaic.version = 11 : i64} {
  func.func @_grad_l1_kernel(%arg0: i32, %arg1: i32, %arg2: memref<1x24x128xf32, #tpu.memory_space<vmem>>, %arg3: memref<1x24x128xf32, #tpu.memory_space<vmem>>, %arg4: memref<1x24x128xf32, #tpu.memory_space<vmem>>, %arg5: memref<1x2x24x128xf32, #tpu.memory_space<vmem>>) attributes {dimension_semantics = [#tpu.dimension_semantics<parallel>, #tpu.dimension_semantics<arbitrary>], iteration_bounds = array<i64: 2, 1>, scalar_prefetch = 0 : i64, scratch_operands = 0 : i64, tpu.core_type = #tpu.core_type<tc>, window_params = [{transform_indices = @transform_0, window_bounds = array<i64: 1, 24, 128>}, {transform_indices = @transform_1, window_bounds = array<i64: 1, 24, 128>}, {transform_indices = @transform_2, window_bounds = array<i64: 1, 24, 128>}, {transform_indices = @transform_3, window_bounds = array<i64: 1, 2, 24, 128>}]} {
    %c0_i32 = arith.constant 0 : i32
    %0 = arith.cmpi eq, %arg1, %c0_i32 : i32
    %1 = arith.extui %0 : i1 to i32
    %c0_i32_0 = arith.constant 0 : i32
    %2 = arith.cmpi ne, %1, %c0_i32_0 : i32
    scf.if %2 {
      %cst_66 = arith.constant 0.000000e+00 : f32
      %146 = vector.broadcast %cst_66 : f32 to vector<1x2x24x128xf32>
      %c0_67 = arith.constant 0 : index
      %c0_68 = arith.constant 0 : index
      %c0_69 = arith.constant 0 : index
      %c0_70 = arith.constant 0 : index
      %147 = vector.load %arg5[%c0_67, %c0_68, %c0_69, %c0_70] : memref<1x2x24x128xf32, #tpu.memory_space<vmem>>, vector<1x2x24x128xf32>
      tpu.vector_store %arg5[%c0_67, %c0_68, %c0_69, %c0_70], %146 {strides = array<i32>} : memref<1x2x24x128xf32, #tpu.memory_space<vmem>>, vector<1x2x24x128xf32>,
    } else {
    }
    %c0 = arith.constant 0 : index
    %c0_1 = arith.constant 0 : index
    %c0_2 = arith.constant 0 : index
    %3 = vector.load %arg2[%c0, %c0_1, %c0_2] : memref<1x24x128xf32, #tpu.memory_space<vmem>>, vector<1x24x128xf32>
    %c0_3 = arith.constant 0 : index
    %c0_4 = arith.constant 0 : index
    %c0_5 = arith.constant 0 : index
    %4 = vector.load %arg3[%c0_3, %c0_4, %c0_5] : memref<1x24x128xf32, #tpu.memory_space<vmem>>, vector<1x24x128xf32>
    %c0_6 = arith.constant 0 : index
    %c0_7 = arith.constant 0 : index
    %c0_8 = arith.constant 0 : index
    %5 = vector.load %arg4[%c0_6, %c0_7, %c0_8] : memref<1x24x128xf32, #tpu.memory_space<vmem>>, vector<1x24x128xf32>
    %c1_i32 = arith.constant 1 : i32
    %6 = tpu.dynamic_rotate %3 by %c1_i32 dim 2 : vector<1x24x128xf32>, i32 -> vector<1x24x128xf32>
    %c1_i32_9 = arith.constant 1 : i32
    %7 = tpu.dynamic_rotate %3 by %c1_i32_9 dim 1 : vector<1x24x128xf32>, i32 -> vector<1x24x128xf32>
    %c1_i32_10 = arith.constant 1 : i32
    %8 = tpu.dynamic_rotate %4 by %c1_i32_10 dim 2 : vector<1x24x128xf32>, i32 -> vector<1x24x128xf32>
    %c1_i32_11 = arith.constant 1 : i32
    %9 = tpu.dynamic_rotate %4 by %c1_i32_11 dim 1 : vector<1x24x128xf32>, i32 -> vector<1x24x128xf32>
    %c1_i32_12 = arith.constant 1 : i32
    %10 = tpu.dynamic_rotate %5 by %c1_i32_12 dim 2 : vector<1x24x128xf32>, i32 -> vector<1x24x128xf32>
    %c1_i32_13 = arith.constant 1 : i32
    %11 = tpu.dynamic_rotate %5 by %c1_i32_13 dim 1 : vector<1x24x128xf32>, i32 -> vector<1x24x128xf32>
    %12 = arith.subf %3, %6 : vector<1x24x128xf32>
    %13 = arith.subf %3, %7 : vector<1x24x128xf32>
    %14 = arith.subf %4, %8 : vector<1x24x128xf32>
    %15 = arith.subf %4, %9 : vector<1x24x128xf32>
    %16 = arith.mulf %12, %12 : vector<1x24x128xf32>
    %17 = arith.mulf %13, %13 : vector<1x24x128xf32>
    %18 = arith.addf %16, %17 : vector<1x24x128xf32>
    %19 = math.sqrt %18 : vector<1x24x128xf32>
    %20 = arith.mulf %14, %14 : vector<1x24x128xf32>
    %21 = arith.mulf %15, %15 : vector<1x24x128xf32>
    %22 = arith.addf %20, %21 : vector<1x24x128xf32>
    %23 = math.sqrt %22 : vector<1x24x128xf32>
    %cst = arith.constant 1.000000e-10 : f32
    %24 = vector.broadcast %cst : f32 to vector<1x24x128xf32>
    %25 = arith.addf %12, %24 : vector<1x24x128xf32>
    %26 = math.absf %13 : vector<1x24x128xf32>
    %27 = math.absf %25 : vector<1x24x128xf32>
    %28 = arith.cmpf ogt, %26, %27 : vector<1x24x128xf32>
    %29 = arith.select %28, %25, %13 : vector<1x24x128xi1>, vector<1x24x128xf32>
    %30 = arith.select %28, %13, %25 : vector<1x24x128xi1>, vector<1x24x128xf32>
    %cst_14 = arith.constant 0.000000e+00 : f32
    %31 = vector.broadcast %cst_14 : f32 to vector<1x24x128xf32>
    %32 = arith.cmpf oeq, %30, %31 : vector<1x24x128xf32>
    %cst_15 = arith.constant 1.000000e-30 : f32
    %33 = vector.broadcast %cst_15 : f32 to vector<1x24x128xf32>
    %34 = arith.select %32, %33, %30 : vector<1x24x128xi1>, vector<1x24x128xf32>
    %35 = tpu.reciprocal %34 {approx = true} : vector<1x24x128xf32> -> vector<1x24x128xf32>
    %36 = arith.mulf %29, %35 : vector<1x24x128xf32>
    %37 = arith.mulf %36, %36 : vector<1x24x128xf32>
    %cst_16 = arith.constant -1.172120e-02 : f32
    %38 = vector.broadcast %cst_16 : f32 to vector<1x24x128xf32>
    %39 = arith.mulf %37, %38 : vector<1x24x128xf32>
    %cst_17 = arith.constant 0.0526533201 : f32
    %40 = vector.broadcast %cst_17 : f32 to vector<1x24x128xf32>
    %41 = arith.addf %40, %39 : vector<1x24x128xf32>
    %42 = arith.mulf %37, %41 : vector<1x24x128xf32>
    %cst_18 = arith.constant -0.116432868 : f32
    %43 = vector.broadcast %cst_18 : f32 to vector<1x24x128xf32>
    %44 = arith.addf %43, %42 : vector<1x24x128xf32>
    %45 = arith.mulf %37, %44 : vector<1x24x128xf32>
    %cst_19 = arith.constant 0.193543464 : f32
    %46 = vector.broadcast %cst_19 : f32 to vector<1x24x128xf32>
    %47 = arith.addf %46, %45 : vector<1x24x128xf32>
    %48 = arith.mulf %37, %47 : vector<1x24x128xf32>
    %cst_20 = arith.constant -0.332623482 : f32
    %49 = vector.broadcast %cst_20 : f32 to vector<1x24x128xf32>
    %50 = arith.addf %49, %48 : vector<1x24x128xf32>
    %51 = arith.mulf %37, %50 : vector<1x24x128xf32>
    %cst_21 = arith.constant 0.999977231 : f32
    %52 = vector.broadcast %cst_21 : f32 to vector<1x24x128xf32>
    %53 = arith.addf %52, %51 : vector<1x24x128xf32>
    %54 = arith.mulf %36, %53 : vector<1x24x128xf32>
    %cst_22 = arith.constant 0.000000e+00 : f32
    %55 = vector.broadcast %cst_22 : f32 to vector<1x24x128xf32>
    %56 = arith.cmpf oge, %13, %55 : vector<1x24x128xf32>
    %cst_23 = arith.constant 1.000000e+00 : f32
    %cst_24 = arith.constant -1.000000e+00 : f32
    %57 = vector.broadcast %cst_23 : f32 to vector<1x24x128xf32>
    %58 = vector.broadcast %cst_24 : f32 to vector<1x24x128xf32>
    %59 = arith.select %56, %57, %58 : vector<1x24x128xi1>, vector<1x24x128xf32>
    %cst_25 = arith.constant 1.57079637 : f32
    %60 = vector.broadcast %cst_25 : f32 to vector<1x24x128xf32>
    %61 = arith.mulf %59, %60 : vector<1x24x128xf32>
    %cst_26 = arith.constant 0.000000e+00 : f32
    %62 = vector.broadcast %cst_26 : f32 to vector<1x24x128xf32>
    %63 = arith.cmpf olt, %25, %62 : vector<1x24x128xf32>
    %cst_27 = arith.constant 3.14159274 : f32
    %64 = vector.broadcast %cst_27 : f32 to vector<1x24x128xf32>
    %65 = arith.mulf %59, %64 : vector<1x24x128xf32>
    %cst_28 = arith.constant 0.000000e+00 : f32
    %66 = vector.broadcast %cst_28 : f32 to vector<1x24x128xf32>
    %67 = arith.select %63, %65, %66 : vector<1x24x128xi1>, vector<1x24x128xf32>
    %68 = arith.select %28, %61, %67 : vector<1x24x128xi1>, vector<1x24x128xf32>
    %cst_29 = arith.constant -1.000000e+00 : f32
    %cst_30 = arith.constant 1.000000e+00 : f32
    %69 = vector.broadcast %cst_29 : f32 to vector<1x24x128xf32>
    %70 = vector.broadcast %cst_30 : f32 to vector<1x24x128xf32>
    %71 = arith.select %28, %69, %70 : vector<1x24x128xi1>, vector<1x24x128xf32>
    %72 = arith.mulf %71, %54 : vector<1x24x128xf32>
    %73 = arith.addf %68, %72 : vector<1x24x128xf32>
    %cst_31 = arith.constant 1.000000e-10 : f32
    %74 = vector.broadcast %cst_31 : f32 to vector<1x24x128xf32>
    %75 = arith.addf %14, %74 : vector<1x24x128xf32>
    %76 = math.absf %15 : vector<1x24x128xf32>
    %77 = math.absf %75 : vector<1x24x128xf32>
    %78 = arith.cmpf ogt, %76, %77 : vector<1x24x128xf32>
    %79 = arith.select %78, %75, %15 : vector<1x24x128xi1>, vector<1x24x128xf32>
    %80 = arith.select %78, %15, %75 : vector<1x24x128xi1>, vector<1x24x128xf32>
    %cst_32 = arith.constant 0.000000e+00 : f32
    %81 = vector.broadcast %cst_32 : f32 to vector<1x24x128xf32>
    %82 = arith.cmpf oeq, %80, %81 : vector<1x24x128xf32>
    %cst_33 = arith.constant 1.000000e-30 : f32
    %83 = vector.broadcast %cst_33 : f32 to vector<1x24x128xf32>
    %84 = arith.select %82, %83, %80 : vector<1x24x128xi1>, vector<1x24x128xf32>
    %85 = tpu.reciprocal %84 {approx = true} : vector<1x24x128xf32> -> vector<1x24x128xf32>
    %86 = arith.mulf %79, %85 : vector<1x24x128xf32>
    %87 = arith.mulf %86, %86 : vector<1x24x128xf32>
    %cst_34 = arith.constant -1.172120e-02 : f32
    %88 = vector.broadcast %cst_34 : f32 to vector<1x24x128xf32>
    %89 = arith.mulf %87, %88 : vector<1x24x128xf32>
    %cst_35 = arith.constant 0.0526533201 : f32
    %90 = vector.broadcast %cst_35 : f32 to vector<1x24x128xf32>
    %91 = arith.addf %90, %89 : vector<1x24x128xf32>
    %92 = arith.mulf %87, %91 : vector<1x24x128xf32>
    %cst_36 = arith.constant -0.116432868 : f32
    %93 = vector.broadcast %cst_36 : f32 to vector<1x24x128xf32>
    %94 = arith.addf %93, %92 : vector<1x24x128xf32>
    %95 = arith.mulf %87, %94 : vector<1x24x128xf32>
    %cst_37 = arith.constant 0.193543464 : f32
    %96 = vector.broadcast %cst_37 : f32 to vector<1x24x128xf32>
    %97 = arith.addf %96, %95 : vector<1x24x128xf32>
    %98 = arith.mulf %87, %97 : vector<1x24x128xf32>
    %cst_38 = arith.constant -0.332623482 : f32
    %99 = vector.broadcast %cst_38 : f32 to vector<1x24x128xf32>
    %100 = arith.addf %99, %98 : vector<1x24x128xf32>
    %101 = arith.mulf %87, %100 : vector<1x24x128xf32>
    %cst_39 = arith.constant 0.999977231 : f32
    %102 = vector.broadcast %cst_39 : f32 to vector<1x24x128xf32>
    %103 = arith.addf %102, %101 : vector<1x24x128xf32>
    %104 = arith.mulf %86, %103 : vector<1x24x128xf32>
    %cst_40 = arith.constant 0.000000e+00 : f32
    %105 = vector.broadcast %cst_40 : f32 to vector<1x24x128xf32>
    %106 = arith.cmpf oge, %15, %105 : vector<1x24x128xf32>
    %cst_41 = arith.constant 1.000000e+00 : f32
    %cst_42 = arith.constant -1.000000e+00 : f32
    %107 = vector.broadcast %cst_41 : f32 to vector<1x24x128xf32>
    %108 = vector.broadcast %cst_42 : f32 to vector<1x24x128xf32>
    %109 = arith.select %106, %107, %108 : vector<1x24x128xi1>, vector<1x24x128xf32>
    %cst_43 = arith.constant 1.57079637 : f32
    %110 = vector.broadcast %cst_43 : f32 to vector<1x24x128xf32>
    %111 = arith.mulf %109, %110 : vector<1x24x128xf32>
    %cst_44 = arith.constant 0.000000e+00 : f32
    %112 = vector.broadcast %cst_44 : f32 to vector<1x24x128xf32>
    %113 = arith.cmpf olt, %75, %112 : vector<1x24x128xf32>
    %cst_45 = arith.constant 3.14159274 : f32
    %114 = vector.broadcast %cst_45 : f32 to vector<1x24x128xf32>
    %115 = arith.mulf %109, %114 : vector<1x24x128xf32>
    %cst_46 = arith.constant 0.000000e+00 : f32
    %116 = vector.broadcast %cst_46 : f32 to vector<1x24x128xf32>
    %117 = arith.select %113, %115, %116 : vector<1x24x128xi1>, vector<1x24x128xf32>
    %118 = arith.select %78, %111, %117 : vector<1x24x128xi1>, vector<1x24x128xf32>
    %cst_47 = arith.constant -1.000000e+00 : f32
    %cst_48 = arith.constant 1.000000e+00 : f32
    %119 = vector.broadcast %cst_47 : f32 to vector<1x24x128xf32>
    %120 = vector.broadcast %cst_48 : f32 to vector<1x24x128xf32>
    %121 = arith.select %78, %119, %120 : vector<1x24x128xi1>, vector<1x24x128xf32>
    %122 = arith.mulf %121, %104 : vector<1x24x128xf32>
    %123 = arith.addf %118, %122 : vector<1x24x128xf32>
    %124 = arith.mulf %5, %10 : vector<1x24x128xf32>
    %125 = arith.mulf %124, %11 : vector<1x24x128xf32>
    %126 = arith.subf %19, %23 : vector<1x24x128xf32>
    %127 = math.absf %126 : vector<1x24x128xf32>
    %128 = arith.subf %73, %123 : vector<1x24x128xf32>
    %129 = math.absf %128 : vector<1x24x128xf32>
    %130 = arith.addf %127, %129 : vector<1x24x128xf32>
    %131 = arith.mulf %130, %125 : vector<1x24x128xf32>
    %c0_49 = arith.constant 0 : index
    %c0_50 = arith.constant 0 : index
    %c0_51 = arith.constant 0 : index
    %c0_52 = arith.constant 0 : index
    %132 = vector.load %arg5[%c0_49, %c0_50, %c0_51, %c0_52] : memref<1x2x24x128xf32, #tpu.memory_space<vmem>>, vector<1x1x24x128xf32>
    %133 = vector.shape_cast %132 : vector<1x1x24x128xf32> to vector<24x128xf32>
    %cst_53 = arith.constant dense<0.000000e+00> : vector<24x128xf32>
    %134 = vector.multi_reduction <add>, %131, %cst_53 [0] : vector<1x24x128xf32> to vector<24x128xf32>
    %135 = arith.addf %133, %134 : vector<24x128xf32>
    %c0_54 = arith.constant 0 : index
    %c0_55 = arith.constant 0 : index
    %c0_56 = arith.constant 0 : index
    %c0_57 = arith.constant 0 : index
    %136 = vector.load %arg5[%c0_54, %c0_55, %c0_56, %c0_57] : memref<1x2x24x128xf32, #tpu.memory_space<vmem>>, vector<1x1x24x128xf32>
    %137 = vector.shape_cast %136 : vector<1x1x24x128xf32> to vector<24x128xf32>
    %138 = vector.shape_cast %135 : vector<24x128xf32> to vector<1x1x24x128xf32>
    tpu.vector_store %arg5[%c0_54, %c0_55, %c0_56, %c0_57], %138 {strides = array<i32>} : memref<1x2x24x128xf32, #tpu.memory_space<vmem>>, vector<1x1x24x128xf32>,
    %c0_58 = arith.constant 0 : index
    %c1 = arith.constant 1 : index
    %c0_59 = arith.constant 0 : index
    %c0_60 = arith.constant 0 : index
    %139 = vector.load %arg5[%c0_58, %c1, %c0_59, %c0_60] : memref<1x2x24x128xf32, #tpu.memory_space<vmem>>, vector<1x1x24x128xf32>
    %140 = vector.shape_cast %139 : vector<1x1x24x128xf32> to vector<24x128xf32>
    %cst_61 = arith.constant dense<0.000000e+00> : vector<24x128xf32>
    %141 = vector.multi_reduction <add>, %125, %cst_61 [0] : vector<1x24x128xf32> to vector<24x128xf32>
    %142 = arith.addf %140, %141 : vector<24x128xf32>
    %c0_62 = arith.constant 0 : index
    %c1_63 = arith.constant 1 : index
    %c0_64 = arith.constant 0 : index
    %c0_65 = arith.constant 0 : index
    %143 = vector.load %arg5[%c0_62, %c1_63, %c0_64, %c0_65] : memref<1x2x24x128xf32, #tpu.memory_space<vmem>>, vector<1x1x24x128xf32>
    %144 = vector.shape_cast %143 : vector<1x1x24x128xf32> to vector<24x128xf32>
    %145 = vector.shape_cast %142 : vector<24x128xf32> to vector<1x1x24x128xf32>
    tpu.vector_store %arg5[%c0_62, %c1_63, %c0_64, %c0_65], %145 {strides = array<i32>} : memref<1x2x24x128xf32, #tpu.memory_space<vmem>>, vector<1x1x24x128xf32>,
    return
  }
  func.func @transform_0(%arg0: i32, %arg1: i32) -> (i32, i32, i32) {
    %c1_i32 = arith.constant 1 : i32
    %0 = arith.muli %arg0, %c1_i32 : i32
    %1 = arith.addi %0, %arg1 : i32
    %c0_i32 = arith.constant 0 : i32
    %c0_i32_0 = arith.constant 0 : i32
    %c0_i32_1 = arith.constant 0 : i32
    return %1, %c0_i32, %c0_i32_0 : i32, i32, i32
  }
  func.func @transform_1(%arg0: i32, %arg1: i32) -> (i32, i32, i32) {
    %c1_i32 = arith.constant 1 : i32
    %0 = arith.muli %arg0, %c1_i32 : i32
    %1 = arith.addi %0, %arg1 : i32
    %c0_i32 = arith.constant 0 : i32
    %c0_i32_0 = arith.constant 0 : i32
    %c0_i32_1 = arith.constant 0 : i32
    return %1, %c0_i32, %c0_i32_0 : i32, i32, i32
  }
  func.func @transform_2(%arg0: i32, %arg1: i32) -> (i32, i32, i32) {
    %c1_i32 = arith.constant 1 : i32
    %0 = arith.muli %arg0, %c1_i32 : i32
    %1 = arith.addi %0, %arg1 : i32
    %c0_i32 = arith.constant 0 : i32
    %c0_i32_0 = arith.constant 0 : i32
    %c0_i32_1 = arith.constant 0 : i32
    return %1, %c0_i32, %c0_i32_0 : i32, i32, i32
  }
  func.func @transform_3(%arg0: i32, %arg1: i32) -> (i32, i32, i32, i32) {
    %c0_i32 = arith.constant 0 : i32
    %c0_i32_0 = arith.constant 0 : i32
    %c0_i32_1 = arith.constant 0 : i32
    %c0_i32_2 = arith.constant 0 : i32
    return %arg0, %c0_i32, %c0_i32_0, %c0_i32_1 : i32, i32, i32, i32
  }
}

</mosaic_0001>

<bundles_post_ra>
// kernel: grad_l1_loss.1
= control target key start
LH: loop header
LB: loop body
LE: loop exit
PB: predicated region body
PF: predicated region fallthrough
CT: control target
= control target key end

     0   :  { %s820_s12 = smov 0   ;;  %s822_s13 = smov 0   ;;  %s1345_s0 = inlined_call_operand.vmem [shape: f32[2,24,128], index: 0, kind: input, shape index: {}]   ;;  %s1346_s1 = inlined_call_operand.vmem [shape: f32[2,24,128], index: 1, kind: input, shape index: {}]   ;;  %s1347_s2 = inlined_call_operand.vmem [shape: f32[2,24,128], index: 2, kind: input, shape index: {}]   ;;  %s1348_s3 = inlined_call_operand.vmem [shape: f32[2,2,24,128], index: 3, kind: output, shape index: {}]  }
   0x1   :  { %s824_s14 = smov 0  }
   0x2 LB: > { %s25_s15 = sadd.s32 1, %s791_s13  ;;  %p706_p0 = scmp.ge.s32.totalorder %s795_s14, 1  ;;  %s795_s14 = sphi %s824_s14, %s13_s14   ;;  %s791_s13 = sphi %s822_s13, %s1369_s13   ;;  %s787_s12 = sphi %s820_s12, %s1368_s12  }
   0x3   : > { %p27_p1 = scmp.ge.s32.totalorder %s25_s15, 2  ;;  %p181_p2 = scmp.lt.s32.totalorder %s795_s14, 3 }
   0x5   : > { %s1371_s15 = smov (%p27_p1, %s25_s15), 0  ;;  %p182_p3 = pnand %p706_p0, %p181_p2 }
   0x7   : > { %185 = sbr.rel (%p182_p3) target bundleno = 209 (0xd1), region = 32 }
   0xc   : > { %p219_p4 = scmp.lt.s32.totalorder %s787_s12, 1  ;;  %s797_s23 = smov 1   ;;  %v272_v9 = vlaneseq  ;;  %v798_v30 = vmov -1.0  }
   0xe   : > { %s1373_s12 = smov (!%p219_p4, %s787_s12), 1  ;;  %v871_v10 = vshrl.u32 %v272_v9, 7 }
   0xf   : > { %s719_s16 = smul.u32 24, %s1373_s12 }
  0x10   : > { %vm274_vm0 = vcmp.lt.s32.totalorder %v871_v10, 1  ;;  %s720_s27 = smul.u32 48, %s1373_s12 }
  0x11   : > { %s223_s19 = scalar_lea.vmem %s1345_s0, %s719_s16  ;;  %s230_s22 = scalar_lea.vmem %s1346_s1, %s719_s16 }
  0x12   : > { %v256_v0 = vld [vmem:[%s223_s19 + $0x10] sm:$0xff]  ;;  %v254_v1 = vld [vmem:[%s223_s19] sm:$0xff]  ;;  %v849_v3 = vld [vmem:[%s223_s19 + $0x8] sm:$0xff]  ;;  %s237_s26 = scalar_lea.vmem %s1347_s2, %s719_s16  ;;  %s1143_s30 = scalar_lea.vmem %s1348_s3, %s720_s27 }
  0x13   : > { %267 = vrot.lane.b32.xlu1 %v256_v0, %s797_s23  ;;  %263 = vrot.lane.b32.xlu0 %v254_v1, %s797_s23  ;;  %v847_v2 = vld [vmem:[%s230_s22] sm:$0xff]  ;;  %v853_v4 = vld [vmem:[%s230_s22 + $0x10] sm:$0xff]  ;;  %v271_v11 = vrot.slane %v256_v0, 7  ;;  %v270_v12 = vrot.slane %v849_v3, 7  ;;  %v269_v13 = vrot.slane %v254_v1, 7 }
  0x14   : > { %v855_v5 = vld [vmem:[%s230_s22 + $0x8] sm:$0xff]  ;;  %v862_v6 = vld [vmem:[%s237_s26] sm:$0xff]  ;;  %v868_v8 = vld [vmem:[%s237_s26 + $0x10] sm:$0xff]  ;;  %v284_v14 = vrot.slane %v847_v2, 7  ;;  %v286_v16 = vrot.slane %v853_v4, 7 }
  0x15   : > { %v864_v7 = vld [vmem:[%s237_s26 + $0x8] sm:$0xff]  ;;  %v275_v15 = vsel %vm274_vm0, %v270_v12, %v271_v11  ;;  %v277_v17 = vsel %vm274_vm0, %v271_v11, %v269_v13  ;;  %v285_v20 = vrot.slane %v855_v5, 7  ;;  %v276_v22 = vsel %vm274_vm0, %v269_v13, %v270_v12 }
  0x16   : > { %v881_v18 = vsub.f32 %v256_v0, %v275_v15  ;;  %v289_v19 = vsel %vm274_vm0, %v286_v16, %v284_v14  ;;  %v886_v21 = vsub.f32 %v254_v1, %v277_v17  ;;  %v895_v24 = vsub.f32 %v849_v3, %v276_v22 }
  0x17   : > { %278 = vrot.lane.b32.xlu1 %v847_v2, %s797_s23  ;;  %265 = vrot.lane.b32.xlu0 %v849_v3, %s797_s23  ;;  %v891_v23 = vsub.f32 %v847_v2, %v289_v19  ;;  %v287_v25 = vsel %vm274_vm0, %v285_v20, %v286_v16  ;;  %v288_v26 = vsel %vm274_vm0, %v284_v14, %v285_v20  ;;  %v296_v27 = vrot.slane %v862_v6, 7 }
  0x18   : > { %vm442_vm1 = vcmp.ge.f32.partialorder %v881_v18, 0.0  ;;  %v297_v28 = vrot.slane %v864_v7, 7  ;;  %vm440_vm2 = vcmp.ge.f32.partialorder %v886_v21, 0.0  ;;  %v298_v29 = vrot.slane %v868_v8, 7 }
  0x19   : > { %v445_v31 = vsel %vm442_vm1, 1.0, %v798_v30  ;;  %v907_v32 = vmul.f32 %v886_v21, %v886_v21  ;;  %v377_v33 = vand.u32 2147483647, %v886_v21  ;;  %v911_v34 = vsub.f32 %v855_v5, %v288_v26 }
  0x1a   : > { %v914_v35 = vsub.f32 %v853_v4, %v287_v25  ;;  %v379_v37 = vand.u32 2147483647, %v881_v18  ;;  %vm536_vm3 = vcmp.ge.f32.partialorder %v891_v23, 0.0  ;;  %v443_v41 = vsel %vm440_vm2, 1.0, %v798_v30 }
  0x1b   : > { %282 = vrot.lane.b32.xlu1 %v853_v4, %s797_s23  ;;  %280 = vrot.lane.b32.xlu0 %v855_v5, %s797_s23  ;;  %vm441_vm4 = vcmp.ge.f32.partialorder %v895_v24, 0.0  ;;  %v923_v42 = vmul.f32 %v881_v18, %v881_v18  ;;  %v925_v43 = vmul.f32 1.5707964, %v445_v31  ;;  %v927_v44 = vmul.f32 3.1415927, %v445_v31 }
  0x1c   : > { %v473_v45 = vand.u32 2147483647, %v891_v23  ;;  %v347_v48 = vmul.f32 %v891_v23, %v891_v23  ;;  %v539_v49 = vsel %vm536_vm3, 1.0, %v798_v30  ;;  %v937_v50 = vmul.f32 1.5707964, %v443_v41 }
  0x1d   : > { %v939_v51 = vmul.f32 3.1415927, %v443_v41  ;;  %v943_v54 = vmul.f32 %v895_v24, %v895_v24  ;;  %v444_v55 = vsel %vm441_vm4, 1.0, %v798_v30  ;;  %v946_v57 = vmul.f32 1.5707964, %v539_v49 }
  0x1e   : > { %v378_v58 = vand.u32 2147483647, %v895_v24  ;;  %v951_v59 = vmul.f32 %v914_v35, %v914_v35  ;;  %v954_v61 = vmul.f32 3.1415927, %v539_v49  ;;  %vm538_vm5 = vcmp.ge.f32.partialorder %v914_v35, 0.0 }
  0x1f   : > { %290 = vrot.lane.b32.xlu0 %v862_v6, %s797_s23  ;;  %292 = vrot.lane.b32.xlu1 %v864_v7, %s797_s23  ;;  %v965_v9 = vmul.f32 3.1415927, %v444_v55  ;;  %v978_v13 = vmul.f32 %v911_v34, %v911_v34  ;;  %vm537_vm9 = vcmp.ge.f32.partialorder %v911_v34, 0.0  ;;  %v541_v17 = vsel %vm538_vm5, 1.0, %v798_v30 }
  0x20   : > { %v474_v25 = vand.u32 2147483647, %v911_v34  ;;  %v996_v41 = vmul.f32 1.5707964, %v541_v17 }
  0x23   : > { %294 = vrot.lane.b32.xlu0 %v868_v8, %s797_s23 }
  0x85   : > { %v268_v36 = vpop.permute.xlu1 %267  ;;  %v264_v38 = vpop.permute.xlu0 %263 }
  0x86   : > { %v918_v39 = vsub.f32 %v256_v0, %v268_v36  ;;  %v302_v40 = vsub.f32 %v254_v1, %v264_v38  ;;  %v963_v1 = vmul.f32 1.5707964, %v444_v55 }
  0x88   : > { %v931_v46 = vadd.f32 1e-10, %v918_v39  ;;  %v933_v47 = vadd.f32 1e-10, %v302_v40  ;;  %v314_v26 = vmul.f32 %v302_v40, %v302_v40 }
  0x89   : > { %v279_v52 = vpop.permute.xlu1 %278  ;;  %v266_v53 = vpop.permute.xlu0 %265 }
  0x8a   : > { %v382_v56 = vand.u32 2147483647, %v931_v46  ;;  %v380_v60 = vand.u32 2147483647, %v933_v47  ;;  %v308_v62 = vsub.f32 %v847_v2, %v279_v52  ;;  %v303_v0 = vsub.f32 %v849_v3, %v266_v53 }
  0x8b   : > { %v475_v2 = vand.u32 2147483647, %v914_v35  ;;  %v1002_v52 = vmul.f32 3.1415927, %v541_v17  ;;  %vm451_vm15 = vcmp.lt.f32.partialorder %v931_v46, 0.0  ;;  %vm449_vm2 = vcmp.lt.f32.partialorder %v933_v47, 0.0 }
  0x8c   : > { %vm958_vm6 = vcmp.gt.f32.partialorder %v379_v37, %v382_v56  ;;  %vm971_vm7 = vcmp.gt.f32.partialorder %v377_v33, %v380_v60  ;;  %v344_v14 = vmul.f32 %v308_v62, %v308_v62  ;;  %v985_v16 = vadd.f32 1e-10, %v308_v62 }
  0x8d   : > { %v391_v11 = vsel %vm958_vm6, %v881_v18, %v931_v46  ;;  %v389_v3 = vsel %vm971_vm7, %v886_v21, %v933_v47  ;;  %v989_v20 = vadd.f32 1e-10, %v303_v0  ;;  %v283_v22 = vpop.permute.xlu1 %282  ;;  %v540_v33 = vsel %vm537_vm9, 1.0, %v798_v30  ;;  %v281_v36 = vpop.permute.xlu0 %280 }
  0x8e   : > { %vm394_vm8 = vcmp.eq.f32.partialorder %v391_v11, 0.0  ;;  %vm392_vm10 = vcmp.eq.f32.partialorder %v389_v3, 0.0  ;;  %v476_v31 = vand.u32 2147483647, %v985_v16  ;;  %v993_v37 = vadd.f32 %v347_v48, %v344_v14 }
  0x8f   : > { %v397_v15 = vsel %vm394_vm8, 1e-30, %v391_v11  ;;  %v395_v19 = vsel %vm392_vm10, 1e-30, %v389_v3  ;;  %v381_v38 = vand.u32 2147483647, %v989_v20  ;;  %v310_v53 = vsub.f32 %v853_v4, %v283_v22 }
  0x90   : > { %749 = vrcp.f32 %v397_v15  ;;  %vm998_vm11 = vcmp.gt.f32.partialorder %v473_v45, %v476_v31  ;;  %v1005_v40 = vmul.f32 1.5707964, %v540_v33  ;;  %v1015_v55 = vmul.f32 3.1415927, %v540_v33 }
  0x91   : > { %751 = vrcp.f32 %v395_v19  ;;  %v485_v30 = vsel %vm998_vm11, %v891_v23, %v985_v16  ;;  %vm1011_vm12 = vcmp.gt.f32.partialorder %v378_v58, %v381_v38  ;;  %v309_v45 = vsub.f32 %v855_v5, %v281_v36  ;;  %v291_v36 = vpop.permute.xlu0 %290 }
  0x92   : > { %v316_v56 = vmul.f32 %v918_v39, %v918_v39  ;;  %v1021_v4 = vadd.f32 %v907_v32, %v314_v26  ;;  %vm488_vm13 = vcmp.eq.f32.partialorder %v485_v30, 0.0  ;;  %v390_v60 = vsel %vm1011_vm12, %v895_v24, %v989_v20 }
  0x93   : > { %753 = vrsqrt.f32 %v993_v37  ;;  %v491_v58 = vsel %vm488_vm13, 1e-30, %v485_v30  ;;  %vm393_vm14 = vcmp.eq.f32.partialorder %v390_v60, 0.0  ;;  %v1028_v62 = vadd.f32 1e-10, %v310_v53 }
  0x94   : > { %755 = vrcp.f32 %v491_v58  ;;  %v396_v5 = vsel %vm393_vm14, 1e-30, %v390_v60  ;;  %v1031_v39 = vadd.f32 1e-10, %v309_v45  ;;  %v301_v11 = vsel %vm274_vm0, %v298_v29, %v296_v27 }
  0x95   : > { %757 = vrcp.f32 %v396_v5  ;;  %v478_v32 = vand.u32 2147483647, %v1028_v62  ;;  %v315_v3 = vmul.f32 %v303_v0, %v303_v0  ;;  %v1048_v15 = vsel %vm274_vm0, %v296_v27, %v297_v28 }
  0x96   : > { %759 = vrsqrt.f32 %v1021_v4  ;;  %v477_v14 = vand.u32 2147483647, %v1031_v39  ;;  %v1051_v17 = vadd.f32 %v923_v42, %v316_v56  ;;  %v1054_v19 = vsel %vm451_vm15, %v927_v44, 0.0 }
  0x97   : > { %vm1056_vm1 = vcmp.gt.f32.partialorder %v475_v2, %v478_v32  ;;  %v1066_v0 = vsel %vm274_vm0, %v297_v28, %v298_v29  ;;  %v346_v27 = vmul.f32 %v310_v53, %v310_v53  ;;  %v388_v2 = vsel %vm958_vm6, %v931_v46, %v881_v18 }
  0x98   : > { %v487_v42 = vsel %vm1056_vm1, %v914_v35, %v1028_v62  ;;  %vm1073_vm3 = vcmp.gt.f32.partialorder %v474_v25, %v477_v14  ;;  %v345_v10 = vmul.f32 %v309_v45, %v309_v45  ;;  %v386_v25 = vsel %vm971_vm7, %v933_v47, %v886_v21 }
  0x99   : > { %vm490_vm4 = vcmp.eq.f32.partialorder %v487_v42, 0.0  ;;  %v486_v28 = vsel %vm1073_vm3, %v911_v34, %v1031_v39  ;;  %v1090_v26 = vadd.f32 %v943_v54, %v315_v3  ;;  %vm545_vm5 = vcmp.lt.f32.partialorder %v985_v16, 0.0 }
  0x9a   : > { %v493_v31 = vsel %vm490_vm4, 1e-30, %v487_v42  ;;  %vm489_vm0 = vcmp.eq.f32.partialorder %v486_v28, 0.0  ;;  %vm450_vm8 = vcmp.lt.f32.partialorder %v989_v20, 0.0  ;;  %v1099_v53 = vadd.f32 %v951_v59, %v346_v27 }
  0x9b   : > { %761 = vrcp.f32 %v493_v31  ;;  %v492_v33 = vsel %vm489_vm0, 1e-30, %v486_v28  ;;  %v1110_v54 = vsel %vm449_vm2, %v939_v51, 0.0  ;;  %v1113_v30 = vadd.f32 %v978_v13, %v345_v10 }
  0x9c   : > { %763 = vrcp.f32 %v492_v33  ;;  %vm547_vm9 = vcmp.lt.f32.partialorder %v1028_v62, 0.0  ;;  %v566_v45 = vmul.f32 %v291_v36, %v862_v6  ;;  %v1126_v47 = vsel %vm545_vm5, %v954_v61, 0.0 }
  0x9d   : > { %v750_v29 = vpop.eup %749  ;;  %765 = vrsqrt.f32 %v1051_v17  ;;  %v1129_v51 = vsel %vm450_vm8, %v965_v9, 0.0  ;;  %vm546_vm10 = vcmp.lt.f32.partialorder %v1031_v39, 0.0  ;;  %v482_v6 = vsel %vm998_vm11, %v985_v16, %v891_v23 }
  0x9e   : > { %v752_v18 = vpop.eup %751  ;;  %v1092_v46 = vmul.f32 %v750_v29, %v388_v2  ;;  %767 = vrsqrt.f32 %v1090_v26  ;;  %v1138_v58 = vmul.f32 %v566_v45, %v301_v11  ;;  %v387_v9 = vsel %vm1011_vm12, %v989_v20, %v895_v24 }
  0x9f   : > { %v1095_v38 = vmul.f32 %v752_v18, %v386_v25  ;;  %769 = vrsqrt.f32 %v1099_v53  ;;  %v1150_v32 = vsel %vm547_vm9, %v1002_v52, 0.0  ;;  %v1156_v3 = vsel %vm546_vm10, %v1015_v55, 0.0  ;;  %v293_v18 = vpop.permute.xlu1 %292 }
  0xa0   : > { %v1105_v21 = vmul.f32 %v1092_v46, %v1092_v46  ;;  %v754_v13 = vpop.eup %753  ;;  %1364 = vst [vmem:[#allocation2_spill] sm:$0xff] %v1138_v58  ;;  %771 = vrsqrt.f32 %v1113_v30  ;;  %v484_v24 = vsel %vm1056_vm1, %v1028_v62, %v914_v35  ;;  %vm355_vm13 = vcmp.eq.f32.partialorder %v993_v37, inf  ;;  %714 = vst [vmem:[%s1143_s30 + $0x18] sm:$0xff] %v1138_v58 }
  0xa1   : > { %v1117_v59 = vmul.f32 %v1095_v38, %v1095_v38  ;;  %v756_v5 = vpop.eup %755  ;;  %v354_v55 = vmul.f32 %v754_v13, %v993_v37  ;;  %vm357_vm14 = vcmp.eq.f32.partialorder %v993_v37, 0.0  ;;  %v483_v35 = vsel %vm1073_vm3, %v1031_v39, %v911_v34 }
  0xa2   : > { %v409_v56 = vmul.f32 -0.0117212, %v1105_v21  ;;  %v758_v23 = vpop.eup %757  ;;  %v1153_v11 = vmul.f32 %v756_v5, %v482_v6  ;;  %v358_v62 = vand.u32 2147483648, %v993_v37  ;;  %v1350_v45 = vmov 1.0  }
  0xa3   : > { %v407_v60 = vmul.f32 -0.0117212, %v1117_v59  ;;  %v760_v14 = vpop.eup %759  ;;  %v1159_v42 = vmul.f32 %v758_v23, %v387_v9  ;;  %v1195_v34 = vsel %vm998_vm11, -1.0, %v1350_v45  ;;  %vm325_vm15 = vcmp.eq.f32.partialorder %v1021_v4, inf }
  0xa4   : > { %v412_v61 = vadd.f32 0.05265332, %v409_v56  ;;  %v1169_v52 = vmul.f32 %v1153_v11, %v1153_v11  ;;  %v324_v31 = vmul.f32 %v760_v14, %v1021_v4  ;;  %vm327_vm2 = vcmp.eq.f32.partialorder %v1021_v4, 0.0 }
  0xa5   : > { %v410_v16 = vadd.f32 0.05265332, %v407_v60  ;;  %v1177_v10 = vmul.f32 %v1159_v42, %v1159_v42  ;;  %v356_v60 = vsel %vm355_vm13, %v993_v37, %v354_v55  ;;  %v567_v23 = vmul.f32 %v293_v18, %v864_v7 }
  0xa6   : > { %v415_v27 = vmul.f32 %v412_v61, %v1105_v21  ;;  %v503_v29 = vmul.f32 -0.0117212, %v1169_v52  ;;  %vm332_vm4 = vcmp.eq.f32.partialorder %v1090_v26, inf  ;;  %vm334_vm0 = vcmp.eq.f32.partialorder %v1090_v26, 0.0 }
  0xa7   : > { %v413_v20 = vmul.f32 %v410_v16, %v1117_v59  ;;  %v408_v36 = vmul.f32 -0.0117212, %v1177_v10  ;;  %vm362_vm5 = vcmp.eq.f32.partialorder %v1113_v30, inf  ;;  %vm339_vm8 = vcmp.eq.f32.partialorder %v1051_v17, inf }
  0xa8   : > { %v418_v2 = vadd.f32 -0.11643287, %v415_v27  ;;  %v762_v39 = vpop.eup %761  ;;  %v506_v13 = vadd.f32 0.05265332, %v503_v29  ;;  %vm369_vm9 = vcmp.eq.f32.partialorder %v1099_v53, inf  ;;  %vm371_vm10 = vcmp.eq.f32.partialorder %v1099_v53, 0.0 }
  0xa9   : > { %v416_v28 = vadd.f32 -0.11643287, %v413_v20  ;;  %v764_v6 = vpop.eup %763  ;;  %v411_v61 = vadd.f32 0.05265332, %v408_v36  ;;  %v1203_v9 = vmul.f32 %v762_v39, %v484_v24  ;;  %v328_v24 = vand.u32 2147483648, %v1021_v4 }
  0xaa   : > { %v421_v33 = vmul.f32 %v418_v2, %v1105_v21  ;;  %v766_v16 = vpop.eup %765  ;;  %v509_v27 = vmul.f32 %v506_v13, %v1169_v52  ;;  %v1207_v20 = vmul.f32 %v764_v6, %v483_v35  ;;  %v326_v2 = vsel %vm325_vm15, %v1021_v4, %v324_v31 }
  0xab   : > { %v419_v56 = vmul.f32 %v416_v28, %v1117_v59  ;;  %v768_v28 = vpop.eup %767  ;;  %v414_v55 = vmul.f32 %v411_v61, %v1177_v10  ;;  %v1213_v29 = vmul.f32 %v1203_v9, %v1203_v9  ;;  %v359_v31 = vsel %vm357_vm14, %v358_v62, %v356_v60 }
  0xac   : > { %v424_v5 = vadd.f32 0.19354346, %v421_v33  ;;  %v1217_v33 = vmul.f32 %v567_v23, %v1048_v15  ;;  %v512_v18 = vadd.f32 -0.11643287, %v509_v27  ;;  %v1222_v35 = vmul.f32 %v1207_v20, %v1207_v20  ;;  %v770_v36 = vpop.eup %769 }
  0xad   : > { %v422_v14 = vadd.f32 0.19354346, %v419_v56  ;;  %v417_v56 = vadd.f32 -0.11643287, %v414_v55  ;;  %v505_v13 = vmul.f32 -0.0117212, %v1213_v29  ;;  %v772_v6 = vpop.eup %771  ;;  %v329_v37 = vsel %vm327_vm2, %v328_v24, %v326_v2 }
  0xae   : > { %v427_v39 = vmul.f32 %v424_v5, %v1105_v21  ;;  %v515_v61 = vmul.f32 %v512_v18, %v1169_v52  ;;  %v504_v23 = vmul.f32 -0.0117212, %v1222_v35  ;;  %v461_v62 = vsel %vm971_vm7, -1.0, %v1350_v45  ;;  %715 = vst [vmem:[%s1143_s30 + $0x20] sm:$0xff] %v1217_v33 }
  0xaf   : > { %v425_v7 = vmul.f32 %v422_v14, %v1117_v59  ;;  %v331_v14 = vmul.f32 %v768_v28, %v1090_v26  ;;  %v420_v27 = vmul.f32 %v417_v56, %v1177_v10  ;;  %v508_v25 = vadd.f32 0.05265332, %v505_v13 }
  0xb0   : > { %v518_v5 = vadd.f32 0.19354346, %v515_v61  ;;  %v507_v55 = vadd.f32 0.05265332, %v504_v23  ;;  %v430_v18 = vadd.f32 -0.33262348, %v427_v39 }
  0xb1   : > { %v428_v15 = vadd.f32 -0.33262348, %v425_v7  ;;  %v572_v7 = vsub.f32 %v329_v37, %v359_v31  ;;  %v423_v58 = vadd.f32 0.19354346, %v420_v27  ;;  %v511_v28 = vmul.f32 %v508_v25, %v1213_v29 }
  0xb2   : > { %v521_v4 = vmul.f32 %v518_v5, %v1169_v52  ;;  %v510_v2 = vmul.f32 %v507_v55, %v1222_v35  ;;  %v333_v24 = vsel %vm332_vm4, %v1090_v26, %v331_v14  ;;  %v458_v25 = vsel %vm971_vm7, %v937_v50, %v1110_v54 }
  0xb3   : > { %v431_v60 = vmul.f32 %v428_v15, %v1117_v59  ;;  %v426_v13 = vmul.f32 %v423_v58, %v1177_v10  ;;  %v514_v45 = vadd.f32 -0.11643287, %v511_v28  ;;  %v335_v59 = vand.u32 2147483648, %v1090_v26 }
  0xb4   : > { %v524_v31 = vadd.f32 -0.33262348, %v521_v4  ;;  %v513_v39 = vadd.f32 -0.11643287, %v510_v2  ;;  %v1252_v15 = vand.u32 2147483647, %v572_v7  ;;  %v433_v61 = vmul.f32 %v430_v18, %v1105_v21  ;;  %v295_v18 = vpop.permute.xlu0 %294 }
  0xb5   : > { %v434_v56 = vadd.f32 0.99997723, %v431_v60  ;;  %v429_v14 = vadd.f32 -0.33262348, %v426_v13  ;;  %v517_v58 = vmul.f32 %v514_v45, %v1213_v29  ;;  %v1259_v37 = vsel %vm334_vm0, %v335_v59, %v333_v24 }
  0xb6   : > { %v527_v27 = vmul.f32 %v524_v31, %v1169_v52  ;;  %v516_v26 = vmul.f32 %v513_v39, %v1222_v35  ;;  %v361_v54 = vmul.f32 %v772_v6, %v1113_v30  ;;  %v338_v21 = vmul.f32 %v766_v16, %v1051_v17 }
  0xb7   : > { %v437_v23 = vmul.f32 %v434_v56, %v1095_v38  ;;  %v432_v12 = vmul.f32 %v429_v14, %v1177_v10  ;;  %v520_v50 = vadd.f32 0.19354346, %v517_v58  ;;  %v365_v5 = vand.u32 2147483648, %v1113_v30 }
  0xb8   : > { %v530_v60 = vadd.f32 0.99997723, %v527_v27  ;;  %v519_v38 = vadd.f32 0.19354346, %v516_v26  ;;  %v459_v52 = vsel %vm1011_vm12, %v963_v1, %v1129_v51  ;;  %v436_v45 = vadd.f32 0.99997723, %v433_v61 }
  0xb9   : > { %v523_v55 = vmul.f32 %v520_v50, %v1213_v29  ;;  %v464_v7 = vmul.f32 %v461_v62, %v437_v23  ;;  %v368_v10 = vmul.f32 %v770_v36, %v1099_v53  ;;  %v435_v28 = vadd.f32 0.99997723, %v432_v12 }
  0xba   : > { %v533_v6 = vmul.f32 %v530_v60, %v1153_v11  ;;  %v522_v16 = vmul.f32 %v519_v38, %v1222_v35  ;;  %vm364_vm7 = vcmp.eq.f32.partialorder %v1113_v30, 0.0  ;;  %v363_v1 = vsel %vm362_vm5, %v1113_v30, %v361_v54  ;;  %v1367_v38 = vld [vmem:[#allocation2_spill] sm:$0xff] }
  0xbb   : > { %v526_v56 = vadd.f32 -0.33262348, %v523_v55  ;;  %v1365_v51 = vmov 1.0   ;;  %v340_v36 = vsel %vm339_vm8, %v1051_v17, %v338_v21  ;;  %v568_v2 = vmul.f32 %v295_v18, %v868_v8 }
  0xbc   : > { %v462_v62 = vsel %vm1011_vm12, -1.0, %v1365_v51  ;;  %v525_v4 = vadd.f32 -0.33262348, %v522_v16  ;;  %v560_v11 = vmul.f32 %v1195_v34, %v533_v6  ;;  %v439_v24 = vmul.f32 %v436_v45, %v1092_v46 }
  0xbd   : > { %v529_v13 = vmul.f32 %v526_v56, %v1213_v29  ;;  %v467_v59 = vadd.f32 %v464_v7, %v458_v25  ;;  %v370_v31 = vsel %vm369_vm9, %v1099_v53, %v368_v10  ;;  %v438_v39 = vmul.f32 %v435_v28, %v1159_v42 }
  0xbe   : > { %v528_v48 = vmul.f32 %v525_v4, %v1222_v35  ;;  %v1366_v34 = vsel %vm998_vm11, %v946_v57, %v1126_v47  ;;  %v571_v23 = vmul.f32 %v568_v2, %v1066_v0  ;;  %vm341_vm12 = vcmp.eq.f32.partialorder %v1051_v17, 0.0 }
  0xbf   : > { %v563_v61 = vadd.f32 %v560_v11, %v1366_v34  ;;  %v532_v8 = vadd.f32 0.99997723, %v529_v13  ;;  %v372_v46 = vand.u32 2147483648, %v1099_v53  ;;  %v463_v49 = vsel %vm958_vm6, -1.0, %v1365_v51 }
  0xc0   : > { %v531_v29 = vadd.f32 0.99997723, %v528_v48  ;;  %v342_v57 = vand.u32 2147483648, %v1051_v17  ;;  %v466_v0 = vmul.f32 %v463_v49, %v439_v24  ;;  %v465_v58 = vmul.f32 %v462_v62, %v438_v39  ;;  %716 = vst [vmem:[%s1143_s30 + $0x28] sm:$0xff] %v571_v23 }
  0xc1   : > { %v578_v42 = vsub.f32 %v467_v59, %v563_v61  ;;  %v535_v35 = vmul.f32 %v532_v8, %v1203_v9  ;;  %v373_v47 = vsel %vm371_vm10, %v372_v46, %v370_v31  ;;  %v559_v53 = vsel %vm1056_vm1, -1.0, %v1365_v51 }
  0xc2   : > { %v534_v25 = vmul.f32 %v531_v29, %v1207_v20  ;;  %v366_v27 = vsel %vm364_vm7, %v365_v5, %v363_v1  ;;  %v558_v9 = vsel %vm1073_vm3, -1.0, %v1365_v51  ;;  %v343_v26 = vsel %vm341_vm12, %v342_v57, %v340_v36 }
  0xc3   : > { %v581_v14 = vand.u32 2147483647, %v578_v42  ;;  %v562_v12 = vmul.f32 %v559_v53, %v535_v35  ;;  %v460_v54 = vsel %vm958_vm6, %v925_v43, %v1054_v19  ;;  %v556_v30 = vsel %vm1056_vm1, %v996_v41, %v1150_v32 }
  0xc4   : > { %v561_v50 = vmul.f32 %v558_v9, %v534_v25  ;;  %v555_v17 = vsel %vm1073_vm3, %v1005_v40, %v1156_v3  ;;  %v469_v21 = vadd.f32 %v466_v0, %v460_v54  ;;  %v468_v45 = vadd.f32 %v465_v58, %v459_v52 }
  0xc5   : > { %v584_v20 = vadd.f32 %v581_v14, %v1252_v15  ;;  %v565_v60 = vadd.f32 %v562_v12, %v556_v30  ;;  %v574_v15 = vsub.f32 %v343_v26, %v373_v47  ;;  %v573_v43 = vsub.f32 %v1259_v37, %v366_v27 }
  0xc6   : > { %v564_v63 = vadd.f32 %v561_v50, %v555_v17 }
  0xc7   : > { %v587_v5 = vmul.f32 %v584_v20, %v1367_v38  ;;  %v580_v19 = vsub.f32 %v469_v21, %v565_v60  ;;  %v577_v22 = vand.u32 2147483647, %v574_v15  ;;  %v576_v32 = vand.u32 2147483647, %v573_v43 }
  0xc8   : > { %v579_v55 = vsub.f32 %v468_v45, %v564_v63 }
  0xc9   : > { %v583_v41 = vand.u32 2147483647, %v580_v19  ;;  %599 = vst [vmem:[%s1143_s30] sm:$0xff] %v587_v5 }
  0xca   : > { %v582_v7 = vand.u32 2147483647, %v579_v55 }
  0xcb   : > { %v586_v44 = vadd.f32 %v583_v41, %v577_v22 }
  0xcc   : > { %v585_v40 = vadd.f32 %v582_v7, %v576_v32 }
  0xcd   : > { %v589_v3 = vmul.f32 %v586_v44, %v571_v23 }
  0xce   : > { %v588_v10 = vmul.f32 %v585_v40, %v1217_v33 }
  0xcf   : > { %601 = vst [vmem:[%s1143_s30 + $0x10] sm:$0xff] %v589_v3 }
  0xd0   : > { %600 = vst [vmem:[%s1143_s30 + $0x8] sm:$0xff] %v588_v10 }
  0xd1 PF: > { %s13_s14 = sadd.s32 1, %s795_s14   ;;  %s1368_s12 = smov %s791_s13 }
  0xd2   : > { %p10_p5 = scmp.ge.s32.totalorder %s13_s14, 4   ;;  %s1369_s13 = smov %s1371_s15 }
  0xd4   :  { %12 = sbr.rel (!%p10_p5) target bundleno = 2 (0x2), region = 73 }

</bundles_post_ra>
